<compile_context>
chip_gen: v7x
topology: tpu7x:2x2x1
jax: 0.10.0
libtpu: 0.0.40
codegen_flags: <defaults>
</compile_context>

<pallas_src>
import functools

import jax
import jax.numpy as jnp
from jax.experimental import pallas as pl
from jax.experimental.pallas import tpu as pltpu

_LANE = 128
_MAX_BLOCK_ROWS = 8192    # (8192, 128) f32 block = 4 MiB per input per step

_STREAM_DTYPES = frozenset(
    jnp.dtype(d) for d in (jnp.float32, jnp.bfloat16, jnp.int8, jnp.uint8,
                           jnp.int32, jnp.uint32))


def _round_up(x, m):
    return ((x + m - 1) // m) * m


def _num_tensorcores():
    """Best-effort TensorCores-per-chip; 1 (always correct) if unrecognized."""
    try:
        kind = jax.devices()[0].device_kind.lower()
    except Exception:
        return 1
    if "v7" in kind or "tpu7" in kind:
        return 2                       # v7x: 2 TensorCores per chip
    if "v4" in kind or "v5p" in kind:
        return 2                       # megacore generations
    return 1                           # v2/v3/v5e/v6e/unknown


def _sublane_rows(dtype):
    # Minimum second-to-last tile dim: 8 (32-bit), 16 (16-bit), 32 (8-bit).
    return max(8, 32 // jnp.dtype(dtype).itemsize)


def _prepare_input(x):
    """Flatten and pick a streaming dtype without a host f32-promotion pass."""
    x = x.reshape(-1)
    if x.dtype == jnp.bool_:
        return x.astype(jnp.int8)      # binary mask: stream 1 B/elem
    if jnp.dtype(x.dtype) in _STREAM_DTYPES:
        return x                       # cast to f32 inside the kernel
    # TODO(synk): exotic dtypes (fp16/f64/i64) pay one host cast pass.
    return x.astype(jnp.float32)


def _dice_kernel(s_ref, t_ref, prod_ref, tot_ref, *, block_rows,
                 blocks_per_core, total_rows, need_mask):
    j = pl.program_id(1)

    @pl.when(j == 0)
    def _init():
        prod_ref[...] = jnp.zeros_like(prod_ref)
        tot_ref[...] = jnp.zeros_like(tot_ref)

    s = s_ref[...].astype(jnp.float32)
    t = t_ref[...].astype(jnp.float32)

    def _accumulate(sv, tv):
        # (block_rows, 128) -> (8, 128): the reshape is a relabeling of the
        # existing (8, 128) tiling and the sum is vreg-wise VPU adds only.
        prod_ref[...] += jnp.sum((sv * tv).reshape(-1, 8, _LANE), axis=0)
        tot_ref[...] += jnp.sum((sv + tv).reshape(-1, 8, _LANE), axis=0)

    if not need_mask:
        _accumulate(s, t)
    else:
        c = pl.program_id(0)
        blk = c * blocks_per_core + j              # un-clamped global block id
        boundary = (blk + 1) * block_rows > total_rows

        @pl.when(jnp.logical_not(boundary))
        def _fast():
            _accumulate(s, t)

        @pl.when(boundary)
        def _masked():
            # Zero rows past the end of the real array (ragged last block and
            # fully out-of-range clamped duplicate blocks).  Pallas does not
            # zero-fill partial blocks, so mask BEFORE any arithmetic.
            row_ids = jax.lax.broadcasted_iota(jnp.int32, (block_rows, _LANE), 0)
            valid = blk * block_rows + row_ids < total_rows
            _accumulate(jnp.where(valid, s, 0.0), jnp.where(valid, t, 0.0))


def dice_loss(score, target):
    """Pallas implementation of DiceLoss.forward(score, target)."""
    s = _prepare_input(score)
    t = _prepare_input(target)

    n = s.shape[0]
    if n % _LANE != 0:
        # TODO(synk): rare unaligned-numel case pays one zero-pad pass.
        pad = _round_up(n, _LANE) - n
        s = jnp.pad(s, (0, pad))
        t = jnp.pad(t, (0, pad))

    total_rows = s.shape[0] // _LANE
    s2 = s.reshape(total_rows, _LANE)
    t2 = t.reshape(total_rows, _LANE)

    gran = max(_sublane_rows(s2.dtype), _sublane_rows(t2.dtype))
    block_rows = min(_round_up(_MAX_BLOCK_ROWS, gran),
                     _round_up(total_rows, gran))
    n_blocks = pl.cdiv(total_rows, block_rows)
    n_cores = min(_num_tensorcores(), n_blocks)
    blocks_per_core = pl.cdiv(n_blocks, n_cores)
    need_mask = (n_cores * blocks_per_core * block_rows != total_rows)

    def in_map(c, j):
        # Clamp so the DMA always targets a real block; duplicate / ragged rows
        # are masked out inside the kernel.
        return (jnp.minimum(c * blocks_per_core + j, n_blocks - 1), 0)

    def out_map(c, j):
        return (c, 0, 0)

    kernel = functools.partial(
        _dice_kernel,
        block_rows=block_rows,
        blocks_per_core=blocks_per_core,
        total_rows=total_rows,
        need_mask=need_mask,
    )

    # Double-buffered inputs dominate VMEM; add headroom for outputs/compiler
    # scratch.  Never exceeds 32 MiB -> safe on every generation's physical VMEM.
    in_bytes = 2 * block_rows * _LANE * (s2.dtype.itemsize + t2.dtype.itemsize)
    vmem_limit = int(max(32 << 20, in_bytes + (8 << 20)))

    prod_part, tot_part = pl.pallas_call(
        kernel,
        out_shape=(
            jax.ShapeDtypeStruct((n_cores, 8, _LANE), jnp.float32),
            jax.ShapeDtypeStruct((n_cores, 8, _LANE), jnp.float32),
        ),
        grid=(n_cores, blocks_per_core),
        in_specs=[
            pl.BlockSpec((block_rows, _LANE), in_map),
            pl.BlockSpec((block_rows, _LANE), in_map),
        ],
        out_specs=(
            pl.BlockSpec((None, 8, _LANE), out_map),
            pl.BlockSpec((None, 8, _LANE), out_map),
        ),
        compiler_params=pltpu.CompilerParams(
            # TODO(synk): on v7x consider pltpu.CORE_PARALLEL on the leading
            # axis if xprof shows only one TensorCore streaming.
            dimension_semantics=("parallel", "arbitrary"),
            vmem_limit_bytes=vmem_limit),
    )(s2, t2)

    smooth = jnp.float32(1e-05)
    intersect = jnp.sum(prod_part)
    denom = jnp.sum(tot_part)          # == sum(score) + sum(target)
    loss = (2.0 * intersect + smooth) / (denom + smooth)
    return 1.0 - loss


def dice_loss_ref(score, target):
    """Pure-JAX reference matching the PyTorch module exactly."""
    target = target.astype(jnp.float32)
    smooth = 1e-05
    intersect = jnp.sum(score * target)
    y_sum = jnp.sum(target)
    z_sum = jnp.sum(score)
    loss = (2 * intersect + smooth) / (z_sum + y_sum + smooth)
    return 1 - loss


if __name__ == "__main__":
    key = jax.random.PRNGKey(0)
    k1, k2, k3 = jax.random.split(key, 3)

    # Typical segmentation shapes: score = sigmoid-ish probabilities,
    # target = binary mask, both NCHW.
    B, C, H, W = 2, 4, 16, 16
    score = jax.nn.sigmoid(jax.random.normal(k1, (B, C, H, W), jnp.float32))
    target_f = (jax.random.uniform(k2, (B, C, H, W)) > 0.5).astype(jnp.float32)

    out = jax.block_until_ready(dice_loss(score, target_f))
    ref = dice_loss_ref(score, target_f)
    assert jnp.allclose(out, ref, rtol=1e-5, atol=1e-6), (out, ref)

    # Bool-mask path: streamed as int8 and cast in-kernel (exercises the
    # masked ragged/partial-block path as well).
    target_b = jax.random.uniform(k3, (B, C, H, W)) > 0.5
    out_b = jax.block_until_ready(dice_loss(score, target_b))
    ref_b = dice_loss_ref(score, target_b)
    assert jnp.allclose(out_b, ref_b, rtol=1e-5, atol=1e-6), (out_b, ref_b)

    print("KERNEL_OK")
</pallas_src>

<mosaic_0001>
module attributes {stable_mosaic.version = 11 : i64} {
  func.func @_dice_kernel(%arg0: i32, %arg1: i32, %arg2: memref<16x128xf32, #tpu.memory_space<vmem>>, %arg3: memref<16x128xf32, #tpu.memory_space<vmem>>, %arg4: memref<1x8x128xf32, #tpu.memory_space<vmem>>, %arg5: memref<1x8x128xf32, #tpu.memory_space<vmem>>) attributes {dimension_semantics = [#tpu.dimension_semantics<parallel>, #tpu.dimension_semantics<arbitrary>], iteration_bounds = array<i64: 1, 1>, scalar_prefetch = 0 : i64, scratch_operands = 0 : i64, tpu.core_type = #tpu.core_type<tc>, window_params = [{transform_indices = @transform_0, window_bounds = array<i64: 16, 128>}, {transform_indices = @transform_1, window_bounds = array<i64: 16, 128>}, {transform_indices = @transform_2, window_bounds = array<i64: 1, 8, 128>}, {transform_indices = @transform_3, window_bounds = array<i64: 1, 8, 128>}]} {
    %c0_i32 = arith.constant 0 : i32
    %0 = arith.cmpi eq, %arg1, %c0_i32 : i32
    %1 = arith.extui %0 : i1 to i32
    %c0_i32_0 = arith.constant 0 : i32
    %2 = arith.cmpi ne, %1, %c0_i32_0 : i32
    scf.if %2 {
      %cst_17 = arith.constant 0.000000e+00 : f32
      %23 = vector.broadcast %cst_17 : f32 to vector<8x128xf32>
      %c0_18 = arith.constant 0 : index
      %c0_19 = arith.constant 0 : index
      %c0_20 = arith.constant 0 : index
      %24 = vector.load %arg4[%c0_18, %c0_19, %c0_20] : memref<1x8x128xf32, #tpu.memory_space<vmem>>, vector<1x8x128xf32>
      %25 = vector.shape_cast %24 : vector<1x8x128xf32> to vector<8x128xf32>
      %26 = vector.shape_cast %23 : vector<8x128xf32> to vector<1x8x128xf32>
      tpu.vector_store %arg4[%c0_18, %c0_19, %c0_20], %26 {strides = array<i32>} : memref<1x8x128xf32, #tpu.memory_space<vmem>>, vector<1x8x128xf32>,
      %cst_21 = arith.constant 0.000000e+00 : f32
      %27 = vector.broadcast %cst_21 : f32 to vector<8x128xf32>
      %c0_22 = arith.constant 0 : index
      %c0_23 = arith.constant 0 : index
      %c0_24 = arith.constant 0 : index
      %28 = vector.load %arg5[%c0_22, %c0_23, %c0_24] : memref<1x8x128xf32, #tpu.memory_space<vmem>>, vector<1x8x128xf32>
      %29 = vector.shape_cast %28 : vector<1x8x128xf32> to vector<8x128xf32>
      %30 = vector.shape_cast %27 : vector<8x128xf32> to vector<1x8x128xf32>
      tpu.vector_store %arg5[%c0_22, %c0_23, %c0_24], %30 {strides = array<i32>} : memref<1x8x128xf32, #tpu.memory_space<vmem>>, vector<1x8x128xf32>,
    } else {
    }
    %c0 = arith.constant 0 : index
    %c0_1 = arith.constant 0 : index
    %3 = vector.load %arg2[%c0, %c0_1] : memref<16x128xf32, #tpu.memory_space<vmem>>, vector<16x128xf32>
    %c0_2 = arith.constant 0 : index
    %c0_3 = arith.constant 0 : index
    %4 = vector.load %arg3[%c0_2, %c0_3] : memref<16x128xf32, #tpu.memory_space<vmem>>, vector<16x128xf32>
    %c0_4 = arith.constant 0 : index
    %c0_5 = arith.constant 0 : index
    %c0_6 = arith.constant 0 : index
    %5 = vector.load %arg4[%c0_4, %c0_5, %c0_6] : memref<1x8x128xf32, #tpu.memory_space<vmem>>, vector<1x8x128xf32>
    %6 = vector.shape_cast %5 : vector<1x8x128xf32> to vector<8x128xf32>
    %7 = arith.mulf %3, %4 : vector<16x128xf32>
    %8 = vector.shape_cast %7 : vector<16x128xf32> to vector<2x8x128xf32>
    %cst = arith.constant dense<0.000000e+00> : vector<8x128xf32>
    %9 = vector.multi_reduction <add>, %8, %cst [0] : vector<2x8x128xf32> to vector<8x128xf32>
    %10 = arith.addf %6, %9 : vector<8x128xf32>
    %c0_7 = arith.constant 0 : index
    %c0_8 = arith.constant 0 : index
    %c0_9 = arith.constant 0 : index
    %11 = vector.load %arg4[%c0_7, %c0_8, %c0_9] : memref<1x8x128xf32, #tpu.memory_space<vmem>>, vector<1x8x128xf32>
    %12 = vector.shape_cast %11 : vector<1x8x128xf32> to vector<8x128xf32>
    %13 = vector.shape_cast %10 : vector<8x128xf32> to vector<1x8x128xf32>
    tpu.vector_store %arg4[%c0_7, %c0_8, %c0_9], %13 {strides = array<i32>} : memref<1x8x128xf32, #tpu.memory_space<vmem>>, vector<1x8x128xf32>,
    %c0_10 = arith.constant 0 : index
    %c0_11 = arith.constant 0 : index
    %c0_12 = arith.constant 0 : index
    %14 = vector.load %arg5[%c0_10, %c0_11, %c0_12] : memref<1x8x128xf32, #tpu.memory_space<vmem>>, vector<1x8x128xf32>
    %15 = vector.shape_cast %14 : vector<1x8x128xf32> to vector<8x128xf32>
    %16 = arith.addf %3, %4 : vector<16x128xf32>
    %17 = vector.shape_cast %16 : vector<16x128xf32> to vector<2x8x128xf32>
    %cst_13 = arith.constant dense<0.000000e+00> : vector<8x128xf32>
    %18 = vector.multi_reduction <add>, %17, %cst_13 [0] : vector<2x8x128xf32> to vector<8x128xf32>
    %19 = arith.addf %15, %18 : vector<8x128xf32>
    %c0_14 = arith.constant 0 : index
    %c0_15 = arith.constant 0 : index
    %c0_16 = arith.constant 0 : index
    %20 = vector.load %arg5[%c0_14, %c0_15, %c0_16] : memref<1x8x128xf32, #tpu.memory_space<vmem>>, vector<1x8x128xf32>
    %21 = vector.shape_cast %20 : vector<1x8x128xf32> to vector<8x128xf32>
    %22 = vector.shape_cast %19 : vector<8x128xf32> to vector<1x8x128xf32>
    tpu.vector_store %arg5[%c0_14, %c0_15, %c0_16], %22 {strides = array<i32>} : memref<1x8x128xf32, #tpu.memory_space<vmem>>, vector<1x8x128xf32>,
    return
  }
  func.func @transform_0(%arg0: i32, %arg1: i32) -> (i32, i32) {
    %c1_i32 = arith.constant 1 : i32
    %0 = arith.muli %arg0, %c1_i32 : i32
    %1 = arith.addi %0, %arg1 : i32
    %c0_i32 = arith.constant 0 : i32
    %2 = arith.minsi %1, %c0_i32 : i32
    %c0_i32_0 = arith.constant 0 : i32
    %c0_i32_1 = arith.constant 0 : i32
    return %2, %c0_i32_0 : i32, i32
  }
  func.func @transform_1(%arg0: i32, %arg1: i32) -> (i32, i32) {
    %c1_i32 = arith.constant 1 : i32
    %0 = arith.muli %arg0, %c1_i32 : i32
    %1 = arith.addi %0, %arg1 : i32
    %c0_i32 = arith.constant 0 : i32
    %2 = arith.minsi %1, %c0_i32 : i32
    %c0_i32_0 = arith.constant 0 : i32
    %c0_i32_1 = arith.constant 0 : i32
    return %2, %c0_i32_0 : i32, i32
  }
  func.func @transform_2(%arg0: i32, %arg1: i32) -> (i32, i32, i32) {
    %c0_i32 = arith.constant 0 : i32
    %c0_i32_0 = arith.constant 0 : i32
    %c0_i32_1 = arith.constant 0 : i32
    return %arg0, %c0_i32, %c0_i32_0 : i32, i32, i32
  }
  func.func @transform_3(%arg0: i32, %arg1: i32) -> (i32, i32, i32) {
    %c0_i32 = arith.constant 0 : i32
    %c0_i32_0 = arith.constant 0 : i32
    %c0_i32_1 = arith.constant 0 : i32
    return %arg0, %c0_i32, %c0_i32_0 : i32, i32, i32
  }
}

</mosaic_0001>

<bundles_post_ra>
// kernel: tpu_custom_call.1
= control target key start
LH: loop header
LB: loop body
LE: loop exit
PB: predicated region body
PF: predicated region fallthrough
CT: control target
= control target key end

     0   :  { %9 = vsyncpa [#allocation3], 0  ;;  %s296_s0 = inlined_call_operand.hbm [shape: f32[16,128], index: 0, kind: input, shape index: {}]   ;;  %s297_s1 = inlined_call_operand.hbm [shape: f32[16,128], index: 1, kind: input, shape index: {}]   ;;  %s298_s2 = inlined_call_operand.hbm [shape: f32[1,8,128], index: 2, kind: output, shape index: {0}]   ;;  %s299_s3 = inlined_call_operand.hbm [shape: f32[1,8,128], index: 3, kind: output, shape index: {1}]  }
   0x1   :  { %10 = vsyncpa [#allocation6], 0 }
   0x2   :  { %11 = vsyncpa [#allocation4], 0 }
   0x3   :  { %12 = vsyncpa [#allocation9], 0  ;;  %s222_s12 = smov [#allocation2]   ;;  %s126_s16 = scalar_lea.hbm %s296_s0, 256 }
   0x4   :  { %s24_s13 = sshll.u32 %s222_s12, 4  ;;  %p127_p0 = scmp.ne.s32.totalorder %s296_s0, %s126_s16  ;;  %s25_s13 = int_to_ptr.vmem [resolvable:$true] %s24_s13 }
   0x5   :  { %p130_p1 = scmp.lt.u32.totalorder %s126_s16, %s296_s0 }
   0x7   :  { %p132_p2 = pnand %p130_p1, %p127_p0 }
   0x9   :  { %135 = shalt.err (!%p132_p2)
}
   0xa   :  { %s136_s21 = scalar_lea.vmem %s25_s13, 256  ;;  %p141_p4 = scmp.lt.s32.totalorder %s25_s13, %s25_s13 }
   0xb   :  { %p137_p3 = scmp.ne.s32.totalorder %s25_s13, %s136_s21  ;;  %p142_p5 = scmp.lt.s32.totalorder %s136_s21, %s136_s21 }
   0xd   :  { %p143_p6 = por %p142_p5, %p141_p4 }
   0xf   :  { %p144_p7 = pnand %p143_p6, %p137_p3 }
  0x11   :  { %147 = shalt.err (!%p144_p7)
}
  0x12   :  { %s223_s22 = smov 128   ;;  %s224_s23 = smov 8  }
  0x13   :  { %30 = dma.hbm_to_vmem [thread:$0]  %s296_s0, 256, %s25_s13, [#allocation3], %s223_s22, %s223_s22, %s224_s23  }
  0x14   :  { %s225_s26 = smov [#allocation5]   ;;  %s148_s30 = scalar_lea.hbm %s297_s1, 256 }
  0x15   :  { %s42_s27 = sshll.u32 %s225_s26, 4  ;;  %p149_p8 = scmp.ne.s32.totalorder %s297_s1, %s148_s30  ;;  %s43_s27 = int_to_ptr.vmem [resolvable:$true] %s42_s27 }
  0x16   :  { %p152_p9 = scmp.lt.u32.totalorder %s148_s30, %s297_s1 }
  0x18   :  { %p154_p10 = pnand %p152_p9, %p149_p8 }
  0x1a   :  { %157 = shalt.err (!%p154_p10)
}
  0x1b   :  { %s158_s8 = scalar_lea.vmem %s43_s27, 256  ;;  %p163_p12 = scmp.lt.s32.totalorder %s43_s27, %s43_s27 }
  0x1c   :  { %p159_p11 = scmp.ne.s32.totalorder %s43_s27, %s158_s8  ;;  %p164_p13 = scmp.lt.s32.totalorder %s158_s8, %s158_s8 }
  0x1e   :  { %p165_p0 = por %p164_p13, %p163_p12 }
  0x20   :  { %p166_p1 = pnand %p165_p0, %p159_p11 }
  0x22   :  { %169 = shalt.err (!%p166_p1)
}
  0x23   :  { %48 = dma.hbm_to_vmem [thread:$0]  %s297_s1, 256, %s43_s27, [#allocation6], %s223_s22, %s223_s22, %s224_s23  }
  0x24   :  { %214 = dma.done.wait [#allocation3], 256  }
  0x25   :  { %215 = vsyncadd [#allocation3], 4294967040 }
  0x26   :  { %216 = dma.done.wait [#allocation6], 256  }
  0x27   :  { %217 = vsyncadd [#allocation6], 4294967040  ;;  %v69_v0 = vld [vmem:[#allocation2] sm:$0xff]  ;;  %v70_v1 = vld [vmem:[#allocation2 + $0x8] sm:$0xff]  ;;  %s226_s10 = smov [#allocation7]   ;;  %s227_s12 = smov [#allocation8]  }
  0x28   :  { %v71_v2 = vld [vmem:[#allocation5] sm:$0xff]  ;;  %v72_v3 = vld [vmem:[#allocation5 + $0x8] sm:$0xff]  ;;  %s91_s11 = sshll.u32 %s226_s10, 4  ;;  %s101_s13 = sshll.u32 %s227_s12, 4  ;;  %s92_s11 = int_to_ptr.vmem [resolvable:$true] %s91_s11  ;;  %s102_s13 = int_to_ptr.vmem [resolvable:$true] %s101_s13 }
  0x29   :  { %v74_v4 = vmul.f32 %v71_v2, %v69_v0  ;;  %v80_v5 = vadd.f32 %v71_v2, %v69_v0  ;;  %v75_v6 = vmul.f32 %v72_v3, %v70_v1  ;;  %v81_v7 = vadd.f32 %v72_v3, %v70_v1  ;;  %s170_s1 = scalar_lea.vmem %s92_s11, 128  ;;  %p175_p3 = scmp.lt.s32.totalorder %s92_s11, %s92_s11 }
  0x2a   :  { %p171_p2 = scmp.ne.s32.totalorder %s92_s11, %s170_s1  ;;  %p176_p4 = scmp.lt.s32.totalorder %s170_s1, %s170_s1 }
  0x2b   :  { %v76_v8 = vadd.f32 %v75_v6, %v74_v4  ;;  %v82_v9 = vadd.f32 %v81_v7, %v80_v5 }
  0x2c   :  { %p177_p5 = por %p176_p4, %p175_p3 }
  0x2d   :  { %78 = vst [vmem:[#allocation7] sm:$0xff] %v76_v8  ;;  %84 = vst [vmem:[#allocation8] sm:$0xff] %v82_v9 }
  0x2e   :  { %p178_p6 = pnand %p177_p5, %p171_p2 }
  0x30   :  { %181 = shalt.err (!%p178_p6)
}
  0x31   :  { %s182_s16 = scalar_lea.hbm %s298_s2, 128 }
  0x32   :  { %p183_p7 = scmp.ne.s32.totalorder %s298_s2, %s182_s16  ;;  %p186_p8 = scmp.lt.u32.totalorder %s182_s16, %s298_s2 }
  0x34   :  { %p188_p9 = pnand %p186_p8, %p183_p7 }
  0x36   :  { %191 = shalt.err (!%p188_p9)
}
  0x37   :  { %94 = dma.vmem_to_hbm [thread:$0]  %s92_s11, 128, %s298_s2, [#allocation4]  }
  0x38   :  { %s192_s23 = scalar_lea.vmem %s102_s13, 128  ;;  %p197_p11 = scmp.lt.s32.totalorder %s102_s13, %s102_s13 }
  0x39   :  { %p193_p10 = scmp.ne.s32.totalorder %s102_s13, %s192_s23  ;;  %p198_p12 = scmp.lt.s32.totalorder %s192_s23, %s192_s23 }
  0x3b   :  { %p199_p13 = por %p198_p12, %p197_p11 }
  0x3d   :  { %p200_p0 = pnand %p199_p13, %p193_p10 }
  0x3f   :  { %203 = shalt.err (!%p200_p0)
}
  0x40   :  { %s204_s26 = scalar_lea.hbm %s299_s3, 128 }
  0x41   :  { %p205_p1 = scmp.ne.s32.totalorder %s299_s3, %s204_s26  ;;  %p208_p2 = scmp.lt.u32.totalorder %s204_s26, %s299_s3 }
  0x43   :  { %p210_p3 = pnand %p208_p2, %p205_p1 }
  0x45   :  { %213 = shalt.err (!%p210_p3)
}
  0x46   :  { %104 = dma.vmem_to_hbm [thread:$0]  %s102_s13, 128, %s299_s3, [#allocation9]  }
  0x47   :  { %218 = dma.done.wait [#allocation4], 128  }
  0x48   :  { %219 = vsyncadd [#allocation4], 4294967168 }
  0x49   :  { %220 = dma.done.wait [#allocation9], 128  }
  0x4a   :  { %221 = vsyncadd [#allocation9], 4294967168 }
  0x4b   :  { %111 = vsyncpa [#allocation3], 1 }
  0x4c   :  { %112 = vsyncpa [#allocation6], 1 }
  0x4d   :  { %113 = vsyncpa [#allocation4], 1 }
  0x4e   :  { %114 = vsyncpa [#allocation9], 1 }

</bundles_post_ra>
